<compile_context>
chip_gen: v7x
topology: tpu7x:2x2x1
jax: 0.10.0
libtpu: 0.0.40
codegen_flags: <defaults>
</compile_context>

<pallas_src>
import functools

import jax
import jax.numpy as jnp
import numpy as np
from jax.experimental import pallas as pl
from jax.experimental.pallas import tpu as pltpu

KSIZE = 7
PAD = (KSIZE - 1) // 2  # 3


def _spatial_attention_kernel(band_ref, x_ref, o_ref, pad_ref, *, H, W):
    # band_ref: (7, 2*W, W) f32     banded Toeplitz conv weights (width padding folded in)
    # x_ref   : (nb, C, H*W)        lane-dense input block (H*W on lanes)
    # o_ref   : (nb, H, W)          sigmoid(conv2d(cat(mean, max)))
    # pad_ref : (nb, H+6, 2*W) f32  row-padded [avg | max] planes
    nb, C, HW = x_ref.shape

    # ---- channel mean/max, lane-dense (C on sublanes, H*W on lanes),
    # chunked over C with f32 accumulation.
    c_chunk = 32 if C > 32 else C
    n_full = C // c_chunk
    rem = C - n_full * c_chunk

    def _chunk_stats(c0, cc):
        xc = x_ref[:, pl.ds(c0, cc), :].astype(jnp.float32)
        return jnp.sum(xc, axis=1), jnp.max(xc, axis=1)

    s = jnp.zeros((nb, HW), jnp.float32)
    m = jnp.full((nb, HW), -jnp.inf, jnp.float32)
    if n_full <= 16:                         # short: static unroll
        for k in range(n_full):
            cs, cm = _chunk_stats(k * c_chunk, c_chunk)
            s, m = s + cs, jnp.maximum(m, cm)
    else:                                    # long: keep code size / live ranges flat
        def body(k, carry):
            sk, mk = carry
            c0 = pl.multiple_of(k * c_chunk, c_chunk)
            cs, cm = _chunk_stats(c0, c_chunk)
            return sk + cs, jnp.maximum(mk, cm)
        s, m = jax.lax.fori_loop(0, n_full, body, (s, m))
    if rem:
        cs, cm = _chunk_stats(n_full * c_chunk, rem)
        s, m = s + cs, jnp.maximum(m, cm)
    avg = s * (1.0 / C)

    # ---- row-padded [avg | max] planes.  Only the PAD top/bottom rows need
    # zeros (width zero-padding lives in the band matrices); everything is
    # rewritten every grid step, so "parallel" batch sharding stays correct.
    zrow = jnp.zeros((nb, PAD, 2 * W), jnp.float32)
    pad_ref[:, :PAD, :] = zrow
    pad_ref[:, PAD + H:, :] = zrow
    for h in range(H):                       # lane-dense plane -> one row per sublane
        cols = slice(h * W, (h + 1) * W)
        pad_ref[:, PAD + h, :W] = avg[:, cols]
        pad_ref[:, PAD + h, W:] = m[:, cols]

    # ---- 7x7 conv (2 -> 1 ch, padding=3, no bias) as 7 MXU matmuls with
    # M = nb*H, batched over the whole block; default matmul precision.
    acc = jnp.zeros((nb * H, W), jnp.float32)
    for i in range(KSIZE):
        lhs = pad_ref[:, i:i + H, :].reshape(nb * H, 2 * W)
        acc = acc + jnp.dot(lhs, band_ref[i], preferred_element_type=jnp.float32)
    o_ref[...] = jax.nn.sigmoid(acc).reshape(nb, H, W).astype(o_ref.dtype)


def _band_matrices(w, W):
    """Fold the (1, 2, 7, 7) conv weight into 7 banded (2*W, W) matrices.

    band[i, c*W + (w_out + j - PAD), w_out] = w[0, c, i, j]; taps falling
    outside [0, W) are dropped (== zero width-padding), so
        out[h, w_out] = sum_i row_pair(h + i - PAD) @ band[i]
    with row_pair = [avg_row | max_row] and zero rows outside [0, H).
    """
    sel = np.zeros((2, KSIZE, 2 * W, W), np.float32)
    for c in range(2):
        for j in range(KSIZE):
            for wo in range(W):
                q = wo + j - PAD
                if 0 <= q < W:
                    sel[c, j, c * W + q, wo] = 1.0
    sel = jnp.asarray(sel)
    return jnp.einsum("cij,cjqw->iqw", w[0].astype(jnp.float32), sel,
                      precision=jax.lax.Precision.HIGHEST)


def _tpu_budgets():
    """Per-generation (input-block budget, vmem limit) in bytes."""
    vmem_phys = None
    try:
        info = pltpu.get_tpu_info()
        for name in ("vmem_capacity_bytes", "vmem_size_bytes", "vmem_bytes"):
            v = getattr(info, name, None)
            if v:
                vmem_phys = int(v)
                break
    except Exception:
        pass
    if vmem_phys is None:
        vmem_phys = 64 << 20                 # unknown -> assume v7x-sized VMEM
    if vmem_phys >= (100 << 20):             # v5e / v6e: 128 MiB physical VMEM
        return 40 << 20, 96 << 20
    return 20 << 20, 52 << 20                # v7x: 64 MiB per TensorCore


def _pick_batch_block(N, C, H, W, itemsize, block_budget):
    """Images per grid step: fill the VMEM budget, aim for nb*H ~ 256 (MXU
    height on v6e/v7x, >=128 on v5e), and keep at least 2 grid steps."""
    per_image = (2 * C * H * W * itemsize        # double-buffered input
                 + 2 * H * W * 4                 # double-buffered output
                 + (H + 2 * PAD) * 2 * W * 4)    # padded [avg | max] scratch
    nb = max(1, block_budget // per_image)
    nb = min(nb, max(1, -(-256 // H)))           # nb*H ~ MXU height
    if N >= 2:
        nb = min(nb, max(1, N // 2))             # >= 2 steps (megacore / pipelining)
    return int(max(1, min(nb, N)))


def spatial_attention(x, w, *, batch_block=None):
    """x: (N, C, H, W); w: (1, 2, 7, 7) -> (N, 1, H, W) float32."""
    N, C, H, W = x.shape
    HW = H * W
    itemsize = np.dtype(x.dtype).itemsize

    block_budget, vmem_cap = _tpu_budgets()
    nb = batch_block or _pick_batch_block(N, C, H, W, itemsize, block_budget)

    # Metadata-only reshape (NCHW is contiguous): gives the kernel lane-dense
    # channel-reduction loads (H*W on lanes).
    x2 = x.reshape(N, C, HW)
    n_pad = (-N) % nb
    if n_pad:
        x2 = jnp.pad(x2, ((0, n_pad), (0, 0), (0, 0)))
    n_total = N + n_pad

    band = _band_matrices(w, W)                  # (7, 2W, W) f32

    vmem_need = (2 * nb * C * HW * itemsize      # double-buffered input block
                 + 2 * nb * HW * 4               # double-buffered output block
                 + 2 * KSIZE * 2 * W * W * 4     # band matrices
                 + nb * (H + 2 * PAD) * 2 * W * 4  # padded scratch
                 + 4 * nb * HW * 4)              # avg/max/acc working values
    vmem_limit = int(min(max(vmem_need + (8 << 20), 16 << 20), vmem_cap))

    # TODO(synk): images whose C*H*W exceeds the per-block VMEM budget need a
    # C-chunk grid axis ("arbitrary") with carried mean/max accumulators.
    kernel = functools.partial(_spatial_attention_kernel, H=H, W=W)
    out = pl.pallas_call(
        kernel,
        out_shape=jax.ShapeDtypeStruct((n_total, H, W), jnp.float32),
        grid_spec=pltpu.PrefetchScalarGridSpec(
            num_scalar_prefetch=0,
            grid=(n_total // nb,),
            in_specs=[
                pl.BlockSpec((KSIZE, 2 * W, W), lambda n: (0, 0, 0)),  # band
                pl.BlockSpec((nb, C, HW), lambda n: (n, 0, 0)),        # x (lane-dense)
            ],
            out_specs=pl.BlockSpec((nb, H, W), lambda n: (n, 0, 0)),
            scratch_shapes=[
                pltpu.VMEM((nb, H + 2 * PAD, 2 * W), jnp.float32),
            ],
        ),
        compiler_params=pltpu.CompilerParams(
            dimension_semantics=("parallel",),   # batch-parallel (v7x megacore)
            vmem_limit_bytes=vmem_limit,
        ),
    )(band, x2)
    return out[:N].reshape(N, 1, H, W)


def reference(x, w):
    avg = jnp.mean(x, axis=1, keepdims=True)
    mx = jnp.max(x, axis=1, keepdims=True)
    xc = jnp.concatenate([avg, mx], axis=1)
    out = jax.lax.conv_general_dilated(
        xc, w, window_strides=(1, 1), padding=((PAD, PAD), (PAD, PAD)),
        dimension_numbers=("NCHW", "OIHW", "NCHW"),
        precision=jax.lax.Precision.HIGHEST)
    return jax.nn.sigmoid(out)


if __name__ == "__main__":
    key = jax.random.PRNGKey(0)
    kx, kw = jax.random.split(key)

    N, C, H, W = 2, 4, 16, 16
    x = jax.random.normal(kx, (N, C, H, W), dtype=jnp.float32)
    # Deterministic synthetic conv weight (nn.Conv2d(2, 1, 7, bias=False)).
    fan_in = 2 * KSIZE * KSIZE
    bound = 1.0 / np.sqrt(fan_in)
    w = jax.random.uniform(kw, (1, 2, KSIZE, KSIZE), dtype=jnp.float32,
                           minval=-bound, maxval=bound)

    out = jax.block_until_ready(spatial_attention(x, w))
    ref = jax.block_until_ready(reference(x, w))
    # Kernel uses default (bf16-pass) MXU precision; reference uses HIGHEST,
    # so the sigmoid-gate tolerance is relaxed accordingly.
    np.testing.assert_allclose(np.asarray(out), np.asarray(ref),
                               atol=2e-2, rtol=2e-2)

    print("KERNEL_OK")
</pallas_src>

<mosaic_0001>
module attributes {stable_mosaic.version = 11 : i64} {
  func.func @_spatial_attention_kernel(%arg0: i32, %arg1: memref<7x32x16xf32, #tpu.memory_space<vmem>>, %arg2: memref<1x4x256xf32, #tpu.memory_space<vmem>>, %arg3: memref<1x16x16xf32, #tpu.memory_space<vmem>>, %arg4: memref<1x22x32xf32, #tpu.memory_space<vmem>>) attributes {dimension_semantics = [#tpu.dimension_semantics<parallel>], iteration_bounds = array<i64: 2>, scalar_prefetch = 0 : i64, scratch_operands = 1 : i64, tpu.core_type = #tpu.core_type<tc>, window_params = [{pipeline_mode = #tpu.pipeline_mode<synchronous>, transform_indices = @transform_0, window_bounds = array<i64: 7, 32, 16>}, {transform_indices = @transform_1, window_bounds = array<i64: 1, 4, 256>}, {transform_indices = @transform_2, window_bounds = array<i64: 1, 16, 16>}]} {
    %cst = arith.constant 0.000000e+00 : f32
    %0 = vector.broadcast %cst : f32 to vector<1x256xf32>
    %cst_0 = arith.constant 0xFF800000 : f32
    %1 = vector.broadcast %cst_0 : f32 to vector<1x256xf32>
    %c0 = arith.constant 0 : index
    %c0_1 = arith.constant 0 : index
    %c0_2 = arith.constant 0 : index
    %2 = vector.load %arg2[%c0, %c0_1, %c0_2] : memref<1x4x256xf32, #tpu.memory_space<vmem>>, vector<1x4x256xf32>
    %cst_3 = arith.constant dense<0.000000e+00> : vector<1x256xf32>
    %3 = vector.multi_reduction <add>, %2, %cst_3 [1] : vector<1x4x256xf32> to vector<1x256xf32>
    %cst_4 = arith.constant dense<0xFF800000> : vector<1x256xf32>
    %4 = vector.multi_reduction <maximumf>, %2, %cst_4 [1] : vector<1x4x256xf32> to vector<1x256xf32>
    %5 = arith.addf %0, %3 : vector<1x256xf32>
    %6 = arith.maximumf %1, %4 : vector<1x256xf32>
    %cst_5 = arith.constant 2.500000e-01 : f32
    %7 = vector.broadcast %cst_5 : f32 to vector<1x256xf32>
    %8 = arith.mulf %5, %7 : vector<1x256xf32>
    %cst_6 = arith.constant 0.000000e+00 : f32
    %9 = vector.broadcast %cst_6 : f32 to vector<1x3x32xf32>
    %c0_7 = arith.constant 0 : index
    %c0_8 = arith.constant 0 : index
    %c0_9 = arith.constant 0 : index
    %10 = vector.load %arg4[%c0_7, %c0_8, %c0_9] : memref<1x22x32xf32, #tpu.memory_space<vmem>>, vector<1x3x32xf32>
    tpu.vector_store %arg4[%c0_7, %c0_8, %c0_9], %9 {strides = array<i32>} : memref<1x22x32xf32, #tpu.memory_space<vmem>>, vector<1x3x32xf32>,
    %c0_10 = arith.constant 0 : index
    %c19 = arith.constant 19 : index
    %c0_11 = arith.constant 0 : index
    %11 = vector.load %arg4[%c0_10, %c19, %c0_11] : memref<1x22x32xf32, #tpu.memory_space<vmem>>, vector<1x3x32xf32>
    tpu.vector_store %arg4[%c0_10, %c19, %c0_11], %9 {strides = array<i32>} : memref<1x22x32xf32, #tpu.memory_space<vmem>>, vector<1x3x32xf32>,
    %12 = vector.extract_strided_slice %8 {offsets = [0, 0], sizes = [1, 16], strides = [1, 1]} : vector<1x256xf32> to vector<1x16xf32>
    %c0_12 = arith.constant 0 : index
    %c3 = arith.constant 3 : index
    %c0_13 = arith.constant 0 : index
    %13 = vector.load %arg4[%c0_12, %c3, %c0_13] : memref<1x22x32xf32, #tpu.memory_space<vmem>>, vector<1x1x16xf32>
    %14 = vector.shape_cast %13 : vector<1x1x16xf32> to vector<1x16xf32>
    %15 = vector.shape_cast %12 : vector<1x16xf32> to vector<1x1x16xf32>
    tpu.vector_store %arg4[%c0_12, %c3, %c0_13], %15 {strides = array<i32>} : memref<1x22x32xf32, #tpu.memory_space<vmem>>, vector<1x1x16xf32>,
    %16 = vector.extract_strided_slice %6 {offsets = [0, 0], sizes = [1, 16], strides = [1, 1]} : vector<1x256xf32> to vector<1x16xf32>
    %c0_14 = arith.constant 0 : index
    %c3_15 = arith.constant 3 : index
    %c16 = arith.constant 16 : index
    %17 = vector.load %arg4[%c0_14, %c3_15, %c16] : memref<1x22x32xf32, #tpu.memory_space<vmem>>, vector<1x1x16xf32>
    %18 = vector.shape_cast %17 : vector<1x1x16xf32> to vector<1x16xf32>
    %19 = vector.shape_cast %16 : vector<1x16xf32> to vector<1x1x16xf32>
    tpu.vector_store %arg4[%c0_14, %c3_15, %c16], %19 {strides = array<i32>} : memref<1x22x32xf32, #tpu.memory_space<vmem>>, vector<1x1x16xf32>,
    %20 = vector.extract_strided_slice %8 {offsets = [0, 16], sizes = [1, 16], strides = [1, 1]} : vector<1x256xf32> to vector<1x16xf32>
    %c0_16 = arith.constant 0 : index
    %c4 = arith.constant 4 : index
    %c0_17 = arith.constant 0 : index
    %21 = vector.load %arg4[%c0_16, %c4, %c0_17] : memref<1x22x32xf32, #tpu.memory_space<vmem>>, vector<1x1x16xf32>
    %22 = vector.shape_cast %21 : vector<1x1x16xf32> to vector<1x16xf32>
    %23 = vector.shape_cast %20 : vector<1x16xf32> to vector<1x1x16xf32>
    tpu.vector_store %arg4[%c0_16, %c4, %c0_17], %23 {strides = array<i32>} : memref<1x22x32xf32, #tpu.memory_space<vmem>>, vector<1x1x16xf32>,
    %24 = vector.extract_strided_slice %6 {offsets = [0, 16], sizes = [1, 16], strides = [1, 1]} : vector<1x256xf32> to vector<1x16xf32>
    %c0_18 = arith.constant 0 : index
    %c4_19 = arith.constant 4 : index
    %c16_20 = arith.constant 16 : index
    %25 = vector.load %arg4[%c0_18, %c4_19, %c16_20] : memref<1x22x32xf32, #tpu.memory_space<vmem>>, vector<1x1x16xf32>
    %26 = vector.shape_cast %25 : vector<1x1x16xf32> to vector<1x16xf32>
    %27 = vector.shape_cast %24 : vector<1x16xf32> to vector<1x1x16xf32>
    tpu.vector_store %arg4[%c0_18, %c4_19, %c16_20], %27 {strides = array<i32>} : memref<1x22x32xf32, #tpu.memory_space<vmem>>, vector<1x1x16xf32>,
    %28 = vector.extract_strided_slice %8 {offsets = [0, 32], sizes = [1, 16], strides = [1, 1]} : vector<1x256xf32> to vector<1x16xf32>
    %c0_21 = arith.constant 0 : index
    %c5 = arith.constant 5 : index
    %c0_22 = arith.constant 0 : index
    %29 = vector.load %arg4[%c0_21, %c5, %c0_22] : memref<1x22x32xf32, #tpu.memory_space<vmem>>, vector<1x1x16xf32>
    %30 = vector.shape_cast %29 : vector<1x1x16xf32> to vector<1x16xf32>
    %31 = vector.shape_cast %28 : vector<1x16xf32> to vector<1x1x16xf32>
    tpu.vector_store %arg4[%c0_21, %c5, %c0_22], %31 {strides = array<i32>} : memref<1x22x32xf32, #tpu.memory_space<vmem>>, vector<1x1x16xf32>,
    %32 = vector.extract_strided_slice %6 {offsets = [0, 32], sizes = [1, 16], strides = [1, 1]} : vector<1x256xf32> to vector<1x16xf32>
    %c0_23 = arith.constant 0 : index
    %c5_24 = arith.constant 5 : index
    %c16_25 = arith.constant 16 : index
    %33 = vector.load %arg4[%c0_23, %c5_24, %c16_25] : memref<1x22x32xf32, #tpu.memory_space<vmem>>, vector<1x1x16xf32>
    %34 = vector.shape_cast %33 : vector<1x1x16xf32> to vector<1x16xf32>
    %35 = vector.shape_cast %32 : vector<1x16xf32> to vector<1x1x16xf32>
    tpu.vector_store %arg4[%c0_23, %c5_24, %c16_25], %35 {strides = array<i32>} : memref<1x22x32xf32, #tpu.memory_space<vmem>>, vector<1x1x16xf32>,
    %36 = vector.extract_strided_slice %8 {offsets = [0, 48], sizes = [1, 16], strides = [1, 1]} : vector<1x256xf32> to vector<1x16xf32>
    %c0_26 = arith.constant 0 : index
    %c6 = arith.constant 6 : index
    %c0_27 = arith.constant 0 : index
    %37 = vector.load %arg4[%c0_26, %c6, %c0_27] : memref<1x22x32xf32, #tpu.memory_space<vmem>>, vector<1x1x16xf32>
    %38 = vector.shape_cast %37 : vector<1x1x16xf32> to vector<1x16xf32>
    %39 = vector.shape_cast %36 : vector<1x16xf32> to vector<1x1x16xf32>
    tpu.vector_store %arg4[%c0_26, %c6, %c0_27], %39 {strides = array<i32>} : memref<1x22x32xf32, #tpu.memory_space<vmem>>, vector<1x1x16xf32>,
    %40 = vector.extract_strided_slice %6 {offsets = [0, 48], sizes = [1, 16], strides = [1, 1]} : vector<1x256xf32> to vector<1x16xf32>
    %c0_28 = arith.constant 0 : index
    %c6_29 = arith.constant 6 : index
    %c16_30 = arith.constant 16 : index
    %41 = vector.load %arg4[%c0_28, %c6_29, %c16_30] : memref<1x22x32xf32, #tpu.memory_space<vmem>>, vector<1x1x16xf32>
    %42 = vector.shape_cast %41 : vector<1x1x16xf32> to vector<1x16xf32>
    %43 = vector.shape_cast %40 : vector<1x16xf32> to vector<1x1x16xf32>
    tpu.vector_store %arg4[%c0_28, %c6_29, %c16_30], %43 {strides = array<i32>} : memref<1x22x32xf32, #tpu.memory_space<vmem>>, vector<1x1x16xf32>,
    %44 = vector.extract_strided_slice %8 {offsets = [0, 64], sizes = [1, 16], strides = [1, 1]} : vector<1x256xf32> to vector<1x16xf32>
    %c0_31 = arith.constant 0 : index
    %c7 = arith.constant 7 : index
    %c0_32 = arith.constant 0 : index
    %45 = vector.load %arg4[%c0_31, %c7, %c0_32] : memref<1x22x32xf32, #tpu.memory_space<vmem>>, vector<1x1x16xf32>
    %46 = vector.shape_cast %45 : vector<1x1x16xf32> to vector<1x16xf32>
    %47 = vector.shape_cast %44 : vector<1x16xf32> to vector<1x1x16xf32>
    tpu.vector_store %arg4[%c0_31, %c7, %c0_32], %47 {strides = array<i32>} : memref<1x22x32xf32, #tpu.memory_space<vmem>>, vector<1x1x16xf32>,
    %48 = vector.extract_strided_slice %6 {offsets = [0, 64], sizes = [1, 16], strides = [1, 1]} : vector<1x256xf32> to vector<1x16xf32>
    %c0_33 = arith.constant 0 : index
    %c7_34 = arith.constant 7 : index
    %c16_35 = arith.constant 16 : index
    %49 = vector.load %arg4[%c0_33, %c7_34, %c16_35] : memref<1x22x32xf32, #tpu.memory_space<vmem>>, vector<1x1x16xf32>
    %50 = vector.shape_cast %49 : vector<1x1x16xf32> to vector<1x16xf32>
    %51 = vector.shape_cast %48 : vector<1x16xf32> to vector<1x1x16xf32>
    tpu.vector_store %arg4[%c0_33, %c7_34, %c16_35], %51 {strides = array<i32>} : memref<1x22x32xf32, #tpu.memory_space<vmem>>, vector<1x1x16xf32>,
    %52 = vector.extract_strided_slice %8 {offsets = [0, 80], sizes = [1, 16], strides = [1, 1]} : vector<1x256xf32> to vector<1x16xf32>
    %c0_36 = arith.constant 0 : index
    %c8 = arith.constant 8 : index
    %c0_37 = arith.constant 0 : index
    %53 = vector.load %arg4[%c0_36, %c8, %c0_37] : memref<1x22x32xf32, #tpu.memory_space<vmem>>, vector<1x1x16xf32>
    %54 = vector.shape_cast %53 : vector<1x1x16xf32> to vector<1x16xf32>
    %55 = vector.shape_cast %52 : vector<1x16xf32> to vector<1x1x16xf32>
    tpu.vector_store %arg4[%c0_36, %c8, %c0_37], %55 {strides = array<i32>} : memref<1x22x32xf32, #tpu.memory_space<vmem>>, vector<1x1x16xf32>,
    %56 = vector.extract_strided_slice %6 {offsets = [0, 80], sizes = [1, 16], strides = [1, 1]} : vector<1x256xf32> to vector<1x16xf32>
    %c0_38 = arith.constant 0 : index
    %c8_39 = arith.constant 8 : index
    %c16_40 = arith.constant 16 : index
    %57 = vector.load %arg4[%c0_38, %c8_39, %c16_40] : memref<1x22x32xf32, #tpu.memory_space<vmem>>, vector<1x1x16xf32>
    %58 = vector.shape_cast %57 : vector<1x1x16xf32> to vector<1x16xf32>
    %59 = vector.shape_cast %56 : vector<1x16xf32> to vector<1x1x16xf32>
    tpu.vector_store %arg4[%c0_38, %c8_39, %c16_40], %59 {strides = array<i32>} : memref<1x22x32xf32, #tpu.memory_space<vmem>>, vector<1x1x16xf32>,
    %60 = vector.extract_strided_slice %8 {offsets = [0, 96], sizes = [1, 16], strides = [1, 1]} : vector<1x256xf32> to vector<1x16xf32>
    %c0_41 = arith.constant 0 : index
    %c9 = arith.constant 9 : index
    %c0_42 = arith.constant 0 : index
    %61 = vector.load %arg4[%c0_41, %c9, %c0_42] : memref<1x22x32xf32, #tpu.memory_space<vmem>>, vector<1x1x16xf32>
    %62 = vector.shape_cast %61 : vector<1x1x16xf32> to vector<1x16xf32>
    %63 = vector.shape_cast %60 : vector<1x16xf32> to vector<1x1x16xf32>
    tpu.vector_store %arg4[%c0_41, %c9, %c0_42], %63 {strides = array<i32>} : memref<1x22x32xf32, #tpu.memory_space<vmem>>, vector<1x1x16xf32>,
    %64 = vector.extract_strided_slice %6 {offsets = [0, 96], sizes = [1, 16], strides = [1, 1]} : vector<1x256xf32> to vector<1x16xf32>
    %c0_43 = arith.constant 0 : index
    %c9_44 = arith.constant 9 : index
    %c16_45 = arith.constant 16 : index
    %65 = vector.load %arg4[%c0_43, %c9_44, %c16_45] : memref<1x22x32xf32, #tpu.memory_space<vmem>>, vector<1x1x16xf32>
    %66 = vector.shape_cast %65 : vector<1x1x16xf32> to vector<1x16xf32>
    %67 = vector.shape_cast %64 : vector<1x16xf32> to vector<1x1x16xf32>
    tpu.vector_store %arg4[%c0_43, %c9_44, %c16_45], %67 {strides = array<i32>} : memref<1x22x32xf32, #tpu.memory_space<vmem>>, vector<1x1x16xf32>,
    %68 = vector.extract_strided_slice %8 {offsets = [0, 112], sizes = [1, 16], strides = [1, 1]} : vector<1x256xf32> to vector<1x16xf32>
    %c0_46 = arith.constant 0 : index
    %c10 = arith.constant 10 : index
    %c0_47 = arith.constant 0 : index
    %69 = vector.load %arg4[%c0_46, %c10, %c0_47] : memref<1x22x32xf32, #tpu.memory_space<vmem>>, vector<1x1x16xf32>
    %70 = vector.shape_cast %69 : vector<1x1x16xf32> to vector<1x16xf32>
    %71 = vector.shape_cast %68 : vector<1x16xf32> to vector<1x1x16xf32>
    tpu.vector_store %arg4[%c0_46, %c10, %c0_47], %71 {strides = array<i32>} : memref<1x22x32xf32, #tpu.memory_space<vmem>>, vector<1x1x16xf32>,
    %72 = vector.extract_strided_slice %6 {offsets = [0, 112], sizes = [1, 16], strides = [1, 1]} : vector<1x256xf32> to vector<1x16xf32>
    %c0_48 = arith.constant 0 : index
    %c10_49 = arith.constant 10 : index
    %c16_50 = arith.constant 16 : index
    %73 = vector.load %arg4[%c0_48, %c10_49, %c16_50] : memref<1x22x32xf32, #tpu.memory_space<vmem>>, vector<1x1x16xf32>
    %74 = vector.shape_cast %73 : vector<1x1x16xf32> to vector<1x16xf32>
    %75 = vector.shape_cast %72 : vector<1x16xf32> to vector<1x1x16xf32>
    tpu.vector_store %arg4[%c0_48, %c10_49, %c16_50], %75 {strides = array<i32>} : memref<1x22x32xf32, #tpu.memory_space<vmem>>, vector<1x1x16xf32>,
    %76 = vector.extract_strided_slice %8 {offsets = [0, 128], sizes = [1, 16], strides = [1, 1]} : vector<1x256xf32> to vector<1x16xf32>
    %c0_51 = arith.constant 0 : index
    %c11 = arith.constant 11 : index
    %c0_52 = arith.constant 0 : index
    %77 = vector.load %arg4[%c0_51, %c11, %c0_52] : memref<1x22x32xf32, #tpu.memory_space<vmem>>, vector<1x1x16xf32>
    %78 = vector.shape_cast %77 : vector<1x1x16xf32> to vector<1x16xf32>
    %79 = vector.shape_cast %76 : vector<1x16xf32> to vector<1x1x16xf32>
    tpu.vector_store %arg4[%c0_51, %c11, %c0_52], %79 {strides = array<i32>} : memref<1x22x32xf32, #tpu.memory_space<vmem>>, vector<1x1x16xf32>,
    %80 = vector.extract_strided_slice %6 {offsets = [0, 128], sizes = [1, 16], strides = [1, 1]} : vector<1x256xf32> to vector<1x16xf32>
    %c0_53 = arith.constant 0 : index
    %c11_54 = arith.constant 11 : index
    %c16_55 = arith.constant 16 : index
    %81 = vector.load %arg4[%c0_53, %c11_54, %c16_55] : memref<1x22x32xf32, #tpu.memory_space<vmem>>, vector<1x1x16xf32>
    %82 = vector.shape_cast %81 : vector<1x1x16xf32> to vector<1x16xf32>
    %83 = vector.shape_cast %80 : vector<1x16xf32> to vector<1x1x16xf32>
    tpu.vector_store %arg4[%c0_53, %c11_54, %c16_55], %83 {strides = array<i32>} : memref<1x22x32xf32, #tpu.memory_space<vmem>>, vector<1x1x16xf32>,
    %84 = vector.extract_strided_slice %8 {offsets = [0, 144], sizes = [1, 16], strides = [1, 1]} : vector<1x256xf32> to vector<1x16xf32>
    %c0_56 = arith.constant 0 : index
    %c12 = arith.constant 12 : index
    %c0_57 = arith.constant 0 : index
    %85 = vector.load %arg4[%c0_56, %c12, %c0_57] : memref<1x22x32xf32, #tpu.memory_space<vmem>>, vector<1x1x16xf32>
    %86 = vector.shape_cast %85 : vector<1x1x16xf32> to vector<1x16xf32>
    %87 = vector.shape_cast %84 : vector<1x16xf32> to vector<1x1x16xf32>
    tpu.vector_store %arg4[%c0_56, %c12, %c0_57], %87 {strides = array<i32>} : memref<1x22x32xf32, #tpu.memory_space<vmem>>, vector<1x1x16xf32>,
    %88 = vector.extract_strided_slice %6 {offsets = [0, 144], sizes = [1, 16], strides = [1, 1]} : vector<1x256xf32> to vector<1x16xf32>
    %c0_58 = arith.constant 0 : index
    %c12_59 = arith.constant 12 : index
    %c16_60 = arith.constant 16 : index
    %89 = vector.load %arg4[%c0_58, %c12_59, %c16_60] : memref<1x22x32xf32, #tpu.memory_space<vmem>>, vector<1x1x16xf32>
    %90 = vector.shape_cast %89 : vector<1x1x16xf32> to vector<1x16xf32>
    %91 = vector.shape_cast %88 : vector<1x16xf32> to vector<1x1x16xf32>
    tpu.vector_store %arg4[%c0_58, %c12_59, %c16_60], %91 {strides = array<i32>} : memref<1x22x32xf32, #tpu.memory_space<vmem>>, vector<1x1x16xf32>,
    %92 = vector.extract_strided_slice %8 {offsets = [0, 160], sizes = [1, 16], strides = [1, 1]} : vector<1x256xf32> to vector<1x16xf32>
    %c0_61 = arith.constant 0 : index
    %c13 = arith.constant 13 : index
    %c0_62 = arith.constant 0 : index
    %93 = vector.load %arg4[%c0_61, %c13, %c0_62] : memref<1x22x32xf32, #tpu.memory_space<vmem>>, vector<1x1x16xf32>
    %94 = vector.shape_cast %93 : vector<1x1x16xf32> to vector<1x16xf32>
    %95 = vector.shape_cast %92 : vector<1x16xf32> to vector<1x1x16xf32>
    tpu.vector_store %arg4[%c0_61, %c13, %c0_62], %95 {strides = array<i32>} : memref<1x22x32xf32, #tpu.memory_space<vmem>>, vector<1x1x16xf32>,
    %96 = vector.extract_strided_slice %6 {offsets = [0, 160], sizes = [1, 16], strides = [1, 1]} : vector<1x256xf32> to vector<1x16xf32>
    %c0_63 = arith.constant 0 : index
    %c13_64 = arith.constant 13 : index
    %c16_65 = arith.constant 16 : index
    %97 = vector.load %arg4[%c0_63, %c13_64, %c16_65] : memref<1x22x32xf32, #tpu.memory_space<vmem>>, vector<1x1x16xf32>
    %98 = vector.shape_cast %97 : vector<1x1x16xf32> to vector<1x16xf32>
    %99 = vector.shape_cast %96 : vector<1x16xf32> to vector<1x1x16xf32>
    tpu.vector_store %arg4[%c0_63, %c13_64, %c16_65], %99 {strides = array<i32>} : memref<1x22x32xf32, #tpu.memory_space<vmem>>, vector<1x1x16xf32>,
    %100 = vector.extract_strided_slice %8 {offsets = [0, 176], sizes = [1, 16], strides = [1, 1]} : vector<1x256xf32> to vector<1x16xf32>
    %c0_66 = arith.constant 0 : index
    %c14 = arith.constant 14 : index
    %c0_67 = arith.constant 0 : index
    %101 = vector.load %arg4[%c0_66, %c14, %c0_67] : memref<1x22x32xf32, #tpu.memory_space<vmem>>, vector<1x1x16xf32>
    %102 = vector.shape_cast %101 : vector<1x1x16xf32> to vector<1x16xf32>
    %103 = vector.shape_cast %100 : vector<1x16xf32> to vector<1x1x16xf32>
    tpu.vector_store %arg4[%c0_66, %c14, %c0_67], %103 {strides = array<i32>} : memref<1x22x32xf32, #tpu.memory_space<vmem>>, vector<1x1x16xf32>,
    %104 = vector.extract_strided_slice %6 {offsets = [0, 176], sizes = [1, 16], strides = [1, 1]} : vector<1x256xf32> to vector<1x16xf32>
    %c0_68 = arith.constant 0 : index
    %c14_69 = arith.constant 14 : index
    %c16_70 = arith.constant 16 : index
    %105 = vector.load %arg4[%c0_68, %c14_69, %c16_70] : memref<1x22x32xf32, #tpu.memory_space<vmem>>, vector<1x1x16xf32>
    %106 = vector.shape_cast %105 : vector<1x1x16xf32> to vector<1x16xf32>
    %107 = vector.shape_cast %104 : vector<1x16xf32> to vector<1x1x16xf32>
    tpu.vector_store %arg4[%c0_68, %c14_69, %c16_70], %107 {strides = array<i32>} : memref<1x22x32xf32, #tpu.memory_space<vmem>>, vector<1x1x16xf32>,
    %108 = vector.extract_strided_slice %8 {offsets = [0, 192], sizes = [1, 16], strides = [1, 1]} : vector<1x256xf32> to vector<1x16xf32>
    %c0_71 = arith.constant 0 : index
    %c15 = arith.constant 15 : index
    %c0_72 = arith.constant 0 : index
    %109 = vector.load %arg4[%c0_71, %c15, %c0_72] : memref<1x22x32xf32, #tpu.memory_space<vmem>>, vector<1x1x16xf32>
    %110 = vector.shape_cast %109 : vector<1x1x16xf32> to vector<1x16xf32>
    %111 = vector.shape_cast %108 : vector<1x16xf32> to vector<1x1x16xf32>
    tpu.vector_store %arg4[%c0_71, %c15, %c0_72], %111 {strides = array<i32>} : memref<1x22x32xf32, #tpu.memory_space<vmem>>, vector<1x1x16xf32>,
    %112 = vector.extract_strided_slice %6 {offsets = [0, 192], sizes = [1, 16], strides = [1, 1]} : vector<1x256xf32> to vector<1x16xf32>
    %c0_73 = arith.constant 0 : index
    %c15_74 = arith.constant 15 : index
    %c16_75 = arith.constant 16 : index
    %113 = vector.load %arg4[%c0_73, %c15_74, %c16_75] : memref<1x22x32xf32, #tpu.memory_space<vmem>>, vector<1x1x16xf32>
    %114 = vector.shape_cast %113 : vector<1x1x16xf32> to vector<1x16xf32>
    %115 = vector.shape_cast %112 : vector<1x16xf32> to vector<1x1x16xf32>
    tpu.vector_store %arg4[%c0_73, %c15_74, %c16_75], %115 {strides = array<i32>} : memref<1x22x32xf32, #tpu.memory_space<vmem>>, vector<1x1x16xf32>,
    %116 = vector.extract_strided_slice %8 {offsets = [0, 208], sizes = [1, 16], strides = [1, 1]} : vector<1x256xf32> to vector<1x16xf32>
    %c0_76 = arith.constant 0 : index
    %c16_77 = arith.constant 16 : index
    %c0_78 = arith.constant 0 : index
    %117 = vector.load %arg4[%c0_76, %c16_77, %c0_78] : memref<1x22x32xf32, #tpu.memory_space<vmem>>, vector<1x1x16xf32>
    %118 = vector.shape_cast %117 : vector<1x1x16xf32> to vector<1x16xf32>
    %119 = vector.shape_cast %116 : vector<1x16xf32> to vector<1x1x16xf32>
    tpu.vector_store %arg4[%c0_76, %c16_77, %c0_78], %119 {strides = array<i32>} : memref<1x22x32xf32, #tpu.memory_space<vmem>>, vector<1x1x16xf32>,
    %120 = vector.extract_strided_slice %6 {offsets = [0, 208], sizes = [1, 16], strides = [1, 1]} : vector<1x256xf32> to vector<1x16xf32>
    %c0_79 = arith.constant 0 : index
    %c16_80 = arith.constant 16 : index
    %c16_81 = arith.constant 16 : index
    %121 = vector.load %arg4[%c0_79, %c16_80, %c16_81] : memref<1x22x32xf32, #tpu.memory_space<vmem>>, vector<1x1x16xf32>
    %122 = vector.shape_cast %121 : vector<1x1x16xf32> to vector<1x16xf32>
    %123 = vector.shape_cast %120 : vector<1x16xf32> to vector<1x1x16xf32>
    tpu.vector_store %arg4[%c0_79, %c16_80, %c16_81], %123 {strides = array<i32>} : memref<1x22x32xf32, #tpu.memory_space<vmem>>, vector<1x1x16xf32>,
    %124 = vector.extract_strided_slice %8 {offsets = [0, 224], sizes = [1, 16], strides = [1, 1]} : vector<1x256xf32> to vector<1x16xf32>
    %c0_82 = arith.constant 0 : index
    %c17 = arith.constant 17 : index
    %c0_83 = arith.constant 0 : index
    %125 = vector.load %arg4[%c0_82, %c17, %c0_83] : memref<1x22x32xf32, #tpu.memory_space<vmem>>, vector<1x1x16xf32>
    %126 = vector.shape_cast %125 : vector<1x1x16xf32> to vector<1x16xf32>
    %127 = vector.shape_cast %124 : vector<1x16xf32> to vector<1x1x16xf32>
    tpu.vector_store %arg4[%c0_82, %c17, %c0_83], %127 {strides = array<i32>} : memref<1x22x32xf32, #tpu.memory_space<vmem>>, vector<1x1x16xf32>,
    %128 = vector.extract_strided_slice %6 {offsets = [0, 224], sizes = [1, 16], strides = [1, 1]} : vector<1x256xf32> to vector<1x16xf32>
    %c0_84 = arith.constant 0 : index
    %c17_85 = arith.constant 17 : index
    %c16_86 = arith.constant 16 : index
    %129 = vector.load %arg4[%c0_84, %c17_85, %c16_86] : memref<1x22x32xf32, #tpu.memory_space<vmem>>, vector<1x1x16xf32>
    %130 = vector.shape_cast %129 : vector<1x1x16xf32> to vector<1x16xf32>
    %131 = vector.shape_cast %128 : vector<1x16xf32> to vector<1x1x16xf32>
    tpu.vector_store %arg4[%c0_84, %c17_85, %c16_86], %131 {strides = array<i32>} : memref<1x22x32xf32, #tpu.memory_space<vmem>>, vector<1x1x16xf32>,
    %132 = vector.extract_strided_slice %8 {offsets = [0, 240], sizes = [1, 16], strides = [1, 1]} : vector<1x256xf32> to vector<1x16xf32>
    %c0_87 = arith.constant 0 : index
    %c18 = arith.constant 18 : index
    %c0_88 = arith.constant 0 : index
    %133 = vector.load %arg4[%c0_87, %c18, %c0_88] : memref<1x22x32xf32, #tpu.memory_space<vmem>>, vector<1x1x16xf32>
    %134 = vector.shape_cast %133 : vector<1x1x16xf32> to vector<1x16xf32>
    %135 = vector.shape_cast %132 : vector<1x16xf32> to vector<1x1x16xf32>
    tpu.vector_store %arg4[%c0_87, %c18, %c0_88], %135 {strides = array<i32>} : memref<1x22x32xf32, #tpu.memory_space<vmem>>, vector<1x1x16xf32>,
    %136 = vector.extract_strided_slice %6 {offsets = [0, 240], sizes = [1, 16], strides = [1, 1]} : vector<1x256xf32> to vector<1x16xf32>
    %c0_89 = arith.constant 0 : index
    %c18_90 = arith.constant 18 : index
    %c16_91 = arith.constant 16 : index
    %137 = vector.load %arg4[%c0_89, %c18_90, %c16_91] : memref<1x22x32xf32, #tpu.memory_space<vmem>>, vector<1x1x16xf32>
    %138 = vector.shape_cast %137 : vector<1x1x16xf32> to vector<1x16xf32>
    %139 = vector.shape_cast %136 : vector<1x16xf32> to vector<1x1x16xf32>
    tpu.vector_store %arg4[%c0_89, %c18_90, %c16_91], %139 {strides = array<i32>} : memref<1x22x32xf32, #tpu.memory_space<vmem>>, vector<1x1x16xf32>,
    %cst_92 = arith.constant 0.000000e+00 : f32
    %140 = vector.broadcast %cst_92 : f32 to vector<16x16xf32>
    %c0_93 = arith.constant 0 : index
    %c0_94 = arith.constant 0 : index
    %c0_95 = arith.constant 0 : index
    %141 = vector.load %arg4[%c0_93, %c0_94, %c0_95] : memref<1x22x32xf32, #tpu.memory_space<vmem>>, vector<1x16x32xf32>
    %142 = vector.shape_cast %141 : vector<1x16x32xf32> to vector<16x32xf32>
    %c0_96 = arith.constant 0 : index
    %c0_97 = arith.constant 0 : index
    %c0_98 = arith.constant 0 : index
    %143 = vector.load %arg1[%c0_96, %c0_97, %c0_98] : memref<7x32x16xf32, #tpu.memory_space<vmem>>, vector<1x32x16xf32>
    %144 = vector.shape_cast %143 : vector<1x32x16xf32> to vector<32x16xf32>
    %cst_99 = arith.constant dense<0.000000e+00> : vector<16x16xf32>
    %145 = tpu.matmul %142, %144, %cst_99 {dimension_numbers = #tpu.dot_dimension_numbers<[1], [0], [0], [1], [0, 0, 1, 1], [], []>} : vector<16x32xf32>, vector<32x16xf32>, vector<16x16xf32> -> vector<16x16xf32>
    %146 = arith.addf %140, %145 : vector<16x16xf32>
    %c0_100 = arith.constant 0 : index
    %c1 = arith.constant 1 : index
    %c0_101 = arith.constant 0 : index
    %147 = vector.load %arg4[%c0_100, %c1, %c0_101] : memref<1x22x32xf32, #tpu.memory_space<vmem>>, vector<1x16x32xf32>
    %148 = vector.shape_cast %147 : vector<1x16x32xf32> to vector<16x32xf32>
    %c1_102 = arith.constant 1 : index
    %c0_103 = arith.constant 0 : index
    %c0_104 = arith.constant 0 : index
    %149 = vector.load %arg1[%c1_102, %c0_103, %c0_104] : memref<7x32x16xf32, #tpu.memory_space<vmem>>, vector<1x32x16xf32>
    %150 = vector.shape_cast %149 : vector<1x32x16xf32> to vector<32x16xf32>
    %cst_105 = arith.constant dense<0.000000e+00> : vector<16x16xf32>
    %151 = tpu.matmul %148, %150, %cst_105 {dimension_numbers = #tpu.dot_dimension_numbers<[1], [0], [0], [1], [0, 0, 1, 1], [], []>} : vector<16x32xf32>, vector<32x16xf32>, vector<16x16xf32> -> vector<16x16xf32>
    %152 = arith.addf %146, %151 : vector<16x16xf32>
    %c0_106 = arith.constant 0 : index
    %c2 = arith.constant 2 : index
    %c0_107 = arith.constant 0 : index
    %153 = vector.load %arg4[%c0_106, %c2, %c0_107] : memref<1x22x32xf32, #tpu.memory_space<vmem>>, vector<1x16x32xf32>
    %154 = vector.shape_cast %153 : vector<1x16x32xf32> to vector<16x32xf32>
    %c2_108 = arith.constant 2 : index
    %c0_109 = arith.constant 0 : index
    %c0_110 = arith.constant 0 : index
    %155 = vector.load %arg1[%c2_108, %c0_109, %c0_110] : memref<7x32x16xf32, #tpu.memory_space<vmem>>, vector<1x32x16xf32>
    %156 = vector.shape_cast %155 : vector<1x32x16xf32> to vector<32x16xf32>
    %cst_111 = arith.constant dense<0.000000e+00> : vector<16x16xf32>
    %157 = tpu.matmul %154, %156, %cst_111 {dimension_numbers = #tpu.dot_dimension_numbers<[1], [0], [0], [1], [0, 0, 1, 1], [], []>} : vector<16x32xf32>, vector<32x16xf32>, vector<16x16xf32> -> vector<16x16xf32>
    %158 = arith.addf %152, %157 : vector<16x16xf32>
    %c0_112 = arith.constant 0 : index
    %c3_113 = arith.constant 3 : index
    %c0_114 = arith.constant 0 : index
    %159 = vector.load %arg4[%c0_112, %c3_113, %c0_114] : memref<1x22x32xf32, #tpu.memory_space<vmem>>, vector<1x16x32xf32>
    %160 = vector.shape_cast %159 : vector<1x16x32xf32> to vector<16x32xf32>
    %c3_115 = arith.constant 3 : index
    %c0_116 = arith.constant 0 : index
    %c0_117 = arith.constant 0 : index
    %161 = vector.load %arg1[%c3_115, %c0_116, %c0_117] : memref<7x32x16xf32, #tpu.memory_space<vmem>>, vector<1x32x16xf32>
    %162 = vector.shape_cast %161 : vector<1x32x16xf32> to vector<32x16xf32>
    %cst_118 = arith.constant dense<0.000000e+00> : vector<16x16xf32>
    %163 = tpu.matmul %160, %162, %cst_118 {dimension_numbers = #tpu.dot_dimension_numbers<[1], [0], [0], [1], [0, 0, 1, 1], [], []>} : vector<16x32xf32>, vector<32x16xf32>, vector<16x16xf32> -> vector<16x16xf32>
    %164 = arith.addf %158, %163 : vector<16x16xf32>
    %c0_119 = arith.constant 0 : index
    %c4_120 = arith.constant 4 : index
    %c0_121 = arith.constant 0 : index
    %165 = vector.load %arg4[%c0_119, %c4_120, %c0_121] : memref<1x22x32xf32, #tpu.memory_space<vmem>>, vector<1x16x32xf32>
    %166 = vector.shape_cast %165 : vector<1x16x32xf32> to vector<16x32xf32>
    %c4_122 = arith.constant 4 : index
    %c0_123 = arith.constant 0 : index
    %c0_124 = arith.constant 0 : index
    %167 = vector.load %arg1[%c4_122, %c0_123, %c0_124] : memref<7x32x16xf32, #tpu.memory_space<vmem>>, vector<1x32x16xf32>
    %168 = vector.shape_cast %167 : vector<1x32x16xf32> to vector<32x16xf32>
    %cst_125 = arith.constant dense<0.000000e+00> : vector<16x16xf32>
    %169 = tpu.matmul %166, %168, %cst_125 {dimension_numbers = #tpu.dot_dimension_numbers<[1], [0], [0], [1], [0, 0, 1, 1], [], []>} : vector<16x32xf32>, vector<32x16xf32>, vector<16x16xf32> -> vector<16x16xf32>
    %170 = arith.addf %164, %169 : vector<16x16xf32>
    %c0_126 = arith.constant 0 : index
    %c5_127 = arith.constant 5 : index
    %c0_128 = arith.constant 0 : index
    %171 = vector.load %arg4[%c0_126, %c5_127, %c0_128] : memref<1x22x32xf32, #tpu.memory_space<vmem>>, vector<1x16x32xf32>
    %172 = vector.shape_cast %171 : vector<1x16x32xf32> to vector<16x32xf32>
    %c5_129 = arith.constant 5 : index
    %c0_130 = arith.constant 0 : index
    %c0_131 = arith.constant 0 : index
    %173 = vector.load %arg1[%c5_129, %c0_130, %c0_131] : memref<7x32x16xf32, #tpu.memory_space<vmem>>, vector<1x32x16xf32>
    %174 = vector.shape_cast %173 : vector<1x32x16xf32> to vector<32x16xf32>
    %cst_132 = arith.constant dense<0.000000e+00> : vector<16x16xf32>
    %175 = tpu.matmul %172, %174, %cst_132 {dimension_numbers = #tpu.dot_dimension_numbers<[1], [0], [0], [1], [0, 0, 1, 1], [], []>} : vector<16x32xf32>, vector<32x16xf32>, vector<16x16xf32> -> vector<16x16xf32>
    %176 = arith.addf %170, %175 : vector<16x16xf32>
    %c0_133 = arith.constant 0 : index
    %c6_134 = arith.constant 6 : index
    %c0_135 = arith.constant 0 : index
    %177 = vector.load %arg4[%c0_133, %c6_134, %c0_135] : memref<1x22x32xf32, #tpu.memory_space<vmem>>, vector<1x16x32xf32>
    %178 = vector.shape_cast %177 : vector<1x16x32xf32> to vector<16x32xf32>
    %c6_136 = arith.constant 6 : index
    %c0_137 = arith.constant 0 : index
    %c0_138 = arith.constant 0 : index
    %179 = vector.load %arg1[%c6_136, %c0_137, %c0_138] : memref<7x32x16xf32, #tpu.memory_space<vmem>>, vector<1x32x16xf32>
    %180 = vector.shape_cast %179 : vector<1x32x16xf32> to vector<32x16xf32>
    %cst_139 = arith.constant dense<0.000000e+00> : vector<16x16xf32>
    %181 = tpu.matmul %178, %180, %cst_139 {dimension_numbers = #tpu.dot_dimension_numbers<[1], [0], [0], [1], [0, 0, 1, 1], [], []>} : vector<16x32xf32>, vector<32x16xf32>, vector<16x16xf32> -> vector<16x16xf32>
    %182 = arith.addf %176, %181 : vector<16x16xf32>
    %183 = arith.negf %182 : vector<16x16xf32>
    %184 = math.exp %183 : vector<16x16xf32>
    %cst_140 = arith.constant 1.000000e+00 : f32
    %185 = vector.broadcast %cst_140 : f32 to vector<16x16xf32>
    %186 = arith.addf %185, %184 : vector<16x16xf32>
    %187 = arith.divf %185, %186 : vector<16x16xf32>
    %188 = vector.shape_cast %187 : vector<16x16xf32> to vector<1x16x16xf32>
    %c0_141 = arith.constant 0 : index
    %c0_142 = arith.constant 0 : index
    %c0_143 = arith.constant 0 : index
    %189 = vector.load %arg3[%c0_141, %c0_142, %c0_143] : memref<1x16x16xf32, #tpu.memory_space<vmem>>, vector<1x16x16xf32>
    tpu.vector_store %arg3[%c0_141, %c0_142, %c0_143], %188 {strides = array<i32>} : memref<1x16x16xf32, #tpu.memory_space<vmem>>, vector<1x16x16xf32>,
    return
  }
  func.func @transform_0(%arg0: i32) -> (i32, i32, i32) {
    %c0_i32 = arith.constant 0 : i32
    %c0_i32_0 = arith.constant 0 : i32
    %c0_i32_1 = arith.constant 0 : i32
    %c0_i32_2 = arith.constant 0 : i32
    return %c0_i32, %c0_i32_0, %c0_i32_1 : i32, i32, i32
  }
  func.func @transform_1(%arg0: i32) -> (i32, i32, i32) {
    %c0_i32 = arith.constant 0 : i32
    %c0_i32_0 = arith.constant 0 : i32
    %c0_i32_1 = arith.constant 0 : i32
    return %arg0, %c0_i32, %c0_i32_0 : i32, i32, i32
  }
  func.func @transform_2(%arg0: i32) -> (i32, i32, i32) {
    %c0_i32 = arith.constant 0 : i32
    %c0_i32_0 = arith.constant 0 : i32
    %c0_i32_1 = arith.constant 0 : i32
    return %arg0, %c0_i32, %c0_i32_0 : i32, i32, i32
  }
}

</mosaic_0001>

<bundles_post_ra>
// kernel: tpu_custom_call.1
= control target key start
LH: loop header
LB: loop body
LE: loop exit
PB: predicated region body
PF: predicated region fallthrough
CT: control target
= control target key end

     0   :  { %7 = vsyncpa [#allocation4], 0  ;;  %s1703_s0 = inlined_call_operand.vmem [shape: f32[7,32,16], index: 0, kind: input, shape index: {}]   ;;  %s1704_s1 = inlined_call_operand.vmem [shape: f32[2,4,256], index: 1, kind: input, shape index: {}]   ;;  %s1705_s2 = inlined_call_operand.hbm [shape: f32[2,16,16], index: 2, kind: output, shape index: {}]  }
   0x1   :  { %9 = vsyncpa [#allocation4 + $0x1], 0  ;;  %s1410_s9 = smov 0   ;;  %s1412_s10 = smov 0  }
   0x2   :  { %s1414_s11 = smov 0   ;;  %s1416_s12 = smov 0  }
   0x3 LB: > { %s1431_s13 = sadd.s32 4294967295, %s1382_s12   ;;  %s1021_s14 = sadd.s32 4294967294, %s1382_s12   ;;  %s1382_s12 = sphi %s1416_s12, %s1711_s12   ;;  %s1378_s11 = sphi %s1414_s11, %s1710_s11   ;;  %s1374_s10 = sphi %s1412_s10, %s1709_s10   ;;  %s1370_s9 = sphi %s1410_s9, %s1708_s9  }
   0x4   : > { %s1435_s15 = sadd.s32 1, %s1382_s12   ;;  %s69_s16 = sadd.s32 1, %s1378_s11 }
   0x5   : > { %s66_s17 = ssub.s32 %s1382_s12, %s1435_s15  ;;  %p79_p0 = scmp.ne.s32.totalorder %s1378_s11, %s1374_s10 }
   0x6   : > { %p67_p1 = scmp.eq.s32.totalorder %s66_s17, 0  ;;  %p80_p2 = scmp.eq.s32.totalorder %s1431_s13, 1 }
   0x7   : > { %p85_p3 = scmp.ne.s32.totalorder %s1374_s10, %s1370_s9  ;;  %p86_p4 = scmp.eq.s32.totalorder %s1021_s14, 1 }
   0x8   : > { %s1446_s18 = scalar_select %p67_p1, %s1378_s11, %s69_s16  }
   0x9   : > { %p1448_p5 = por %p80_p2, %p79_p0  ;;  %p1452_p6 = por %p86_p4, %p85_p3 }
   0xa   : > { %p1024_p7 = scmp.ge.s32.totalorder %s1382_s12, 1  ;;  %p115_p8 = scmp.lt.s32.totalorder %s1382_s12, 3 }
   0xc   : > { %p116_p9 = pnand %p1024_p7, %p115_p8 }
   0xd   : > { %p137_p10 = scmp.lt.s32.totalorder (!%p116_p9), %s1431_s13, 1  ;;  %vm146_vm0 = vcmask (!%p116_p9), 1043456   ;;  %vm182_vm1 = vcmask (!%p116_p9), 122880   ;;  %s1384_s26 = smov (!%p116_p9), 112   ;;  %vm179_vm2 = vcmask (!%p116_p9), 256000   ;;  %v1388_v25 = vmov (!%p116_p9), 0.0  }
   0xe   : > { %119 = sbr.rel (%p116_p9) target bundleno = 494 (0x1ee), region = 28  ;;  %s1385_s27 = smov (!%p116_p9), 16   ;;  %180 = vst.msk [vmem:[#allocation2] sm:$0x7] (!%p116_p9), %vm179_vm2, %v1388_v25  ;;  %181 = vst.msk [vmem:[#allocation2 + $0x13] sm:$0x7] (!%p116_p9), %vm179_vm2, %v1388_v25 }
   0xf   : > { %s1386_s28 = smov (!%p116_p9), 80   ;;  %s1387_s29 = smov (!%p116_p9), 96   ;;  %v1028_v32 = vld [vmem:[%s1703_s0 + $0x20] sm:$0xff] (!%p116_p9)  ;;  %v1029_v33 = vld [vmem:[%s1703_s0 + $0x28] sm:$0xff] (!%p116_p9)  ;;  %v1030_v39 = vld [vmem:[%s1703_s0 + $0x30] sm:$0xff] (!%p116_p9)  ;;  %vm188_vm3 = vcmask (!%p116_p9), 254080  }
  0x10   : > { %s1389_s30 = smov (!%p116_p9), 64   ;;  %s1390_s3 = smov (!%p116_p9), 48   ;;  %v1194_v34 = vpack.c.bf16 (!%p116_p9), %v1029_v33, %v1028_v32  ;;  %v1042_v35 = vld [vmem:[%s1703_s0 + $0x60] sm:$0xff] (!%p116_p9)  ;;  %v1043_v36 = vld [vmem:[%s1703_s0 + $0x68] sm:$0xff] (!%p116_p9)  ;;  %v1031_v40 = vld [vmem:[%s1703_s0 + $0x38] sm:$0xff] (!%p116_p9)  ;;  %vm317_vm4 = vcmask (!%p116_p9), 261120  }
  0x11   : > { %s1391_s4 = smov (!%p116_p9), 32   ;;  %v1218_v38 = vpack.c.bf16 (!%p116_p9), %v1043_v36, %v1042_v35  ;;  %v1198_v41 = vpack.c.bf16 (!%p116_p9), %v1031_v40, %v1030_v39  ;;  %v1044_v42 = vld [vmem:[%s1703_s0 + $0x70] sm:$0xff] (!%p116_p9)  ;;  %v1045_v43 = vld [vmem:[%s1703_s0 + $0x78] sm:$0xff] (!%p116_p9)  ;;  %v306_v45 = vld [vmem:[%s1703_s0] sm:$0xff] (!%p116_p9)  ;;  %s134_s17 = sand.u32 (!%p116_p9), 1, %s1374_s10   ;;  %vm942_vm5 = vcmask (!%p116_p9), 130048  }
  0x12   : > { %1195 = vmatprep.subr.bf16.mxu1 (!%p116_p9), %v1194_v34  ;;  %v1222_v44 = vpack.c.bf16 (!%p116_p9), %v1045_v43, %v1044_v42  ;;  %v307_v46 = vld [vmem:[%s1703_s0 + $0x8] sm:$0xff] (!%p116_p9)  ;;  %v1048_v48 = vld [vmem:[%s1703_s0 + $0x80] sm:$0xff] (!%p116_p9)  ;;  %v1039_v32 = vld [vmem:[%s1703_s0 + $0x58] sm:$0xff] (!%p116_p9) }
  0x13   : > { %1197 = vmatpush3.bf16.msra.mxu1 (!%p116_p9), %v1194_v34  ;;  %1219 = vmatprep.subr.bf16.mxu0 (!%p116_p9), %v1218_v38  ;;  %v1533_v47 = vpack.c.bf16 (!%p116_p9), %v307_v46, %v306_v45  ;;  %v1049_v49 = vld [vmem:[%s1703_s0 + $0x88] sm:$0xff] (!%p116_p9)  ;;  %v1060_v42 = vld [vmem:[%s1703_s0 + $0xc0] sm:$0xff] (!%p116_p9) }
  0x14   : > { %1199 = vmatprep.subr.bf16.mxu1 (!%p116_p9), %v1198_v41  ;;  %1221 = vmatpush3.bf16.msra.mxu0 (!%p116_p9), %v1218_v38  ;;  %v1546_v50 = vpack.c.bf16 (!%p116_p9), %v1049_v49, %v1048_v48  ;;  %v1037_v25 = vld [vmem:[%s1703_s0 + $0x48] sm:$0xff] (!%p116_p9)  ;;  %v1057_v38 = vld [vmem:[%s1703_s0 + $0xb8] sm:$0xff] (!%p116_p9) }
  0x15   : > { %s138_s21 = scalar_select %p137_p10, %s1431_s13, 1  ;;  %1223 = vmatprep.subr.bf16.mxu0 %v1222_v44  ;;  %v1061_v43 = vld [vmem:[%s1703_s0 + $0xc8] sm:$0xff]  ;;  %v1063_v48 = vld [vmem:[%s1703_s0 + $0xd8] sm:$0xff] }
  0x16   : > { %v1242_v45 = vpack.c.bf16 %v1061_v43, %v1060_v42 }
  0x17   : > { %s1073_s22 = sshll.u32 %s138_s21, 3  ;;  %1201 = vmatpush3.bf16.msra.mxu1 %v1198_v41  ;;  %s1025_s21 = sshll.u32 %s134_s17, 4 }
  0x18   : > { %s141_s25 = scalar_lea.vmem %s1704_s1, %s1073_s22  ;;  %1203 = vmatprep.subr.bf16.mxu1 %v1533_v47  ;;  %1225 = vmatpush3.bf16.msra.mxu0 %v1222_v44  ;;  %s136_s22 = scalar_lea.vmem [#allocation3], %s1025_s21 }
  0x19   : > { %v142_v0 = vld [vmem:[%s141_s25] sm:$0xff]  ;;  %1227 = vmatprep.subr.bf16.mxu0 %v1546_v50  ;;  %s959_s23 = sshll.u32 %s136_s22, 4  ;;  %s1660_s23 = int_to_ptr.vmem [resolvable:$true] %s959_s23 }
  0x1a   : > { %v161_v1 = vsel %vm146_vm0, %v142_v0, -inf  ;;  %v147_v2 = vsel %vm146_vm0, %v142_v0, 0.0  ;;  %v144_v3 = vcombine.high %v142_v0, %v142_v0 }
  0x1b   : > { %v162_v4 = vrot.slane %v161_v1, 4  ;;  %v148_v5 = vrot.slane %v147_v2, 4 }
  0x1c   : > { %v154_v6 = vsel %vm146_vm0, %v144_v3, 0.0  ;;  %v168_v26 = vsel %vm146_vm0, %v144_v3, -inf }
  0x1d   : > { %v163_v7 = vmax.f32 %v161_v1, %v162_v4  ;;  %v149_v8 = vadd.f32 %v148_v5, %v147_v2  ;;  %v155_v9 = vrot.slane %v154_v6, 4  ;;  %v169_v27 = vrot.slane %v168_v26, 4 }
  0x1f   : > { %v164_v10 = vrot.slane %v163_v7, 2  ;;  %v150_v11 = vrot.slane %v149_v8, 2  ;;  %v156_v12 = vadd.f32 %v155_v9, %v154_v6  ;;  %v170_v28 = vmax.f32 %v168_v26, %v169_v27 }
  0x21   : > { %v165_v13 = vmax.f32 %v163_v7, %v164_v10  ;;  %v151_v14 = vadd.f32 %v150_v11, %v149_v8  ;;  %v157_v15 = vrot.slane %v156_v12, 2  ;;  %v171_v29 = vrot.slane %v170_v28, 2 }
  0x23   : > { %v166_v16 = vrot.slane %v165_v13, 1  ;;  %v152_v17 = vrot.slane %v151_v14, 1  ;;  %v158_v18 = vadd.f32 %v157_v15, %v156_v12  ;;  %v172_v30 = vmax.f32 %v170_v28, %v171_v29  ;;  %v1054_v29 = vld [vmem:[%s1703_s0 + $0xa0] sm:$0xff] }
  0x25   : > { %v1466_v19 = vmax.f32 %v165_v13, %v166_v16  ;;  %v153_v20 = vadd.f32 %v152_v17, %v151_v14  ;;  %v159_v21 = vrot.slane %v158_v18, 1  ;;  %v173_v31 = vrot.slane %v172_v30, 1  ;;  %v308_v17 = vld [vmem:[%s1703_s0 + $0x10] sm:$0xff] }
  0x27   : > { %200 = vrot.lane.b32.xlu0 %v1466_v19, %s1384_s26  ;;  %185 = vrot.lane.b32.xlu1 %v1466_v19, %s1385_s27  ;;  %v177_v22 = vmul.f32 0.25, %v153_v20  ;;  %v160_v23 = vadd.f32 %v159_v21, %v158_v18  ;;  %v1510_v37 = vmax.f32 %v172_v30, %v173_v31  ;;  %v309_v18 = vld [vmem:[%s1703_s0 + $0x18] sm:$0xff]  ;;  %v1050_v21 = vld [vmem:[%s1703_s0 + $0x90] sm:$0xff] }
  0x28   : > { %v1055_v30 = vld [vmem:[%s1703_s0 + $0xa8] sm:$0xff]  ;;  %v1038_v31 = vld [vmem:[%s1703_s0 + $0x50] sm:$0xff] }
  0x29   : > { %v178_v24 = vmul.f32 0.25, %v160_v23  ;;  %183 = vst.msk [vmem:[#allocation2 + $0x3] sm:$0x1] %vm182_vm1, %v177_v22  ;;  %v1234_v34 = vpack.c.bf16 %v1055_v30, %v1054_v29  ;;  %v1214_v36 = vpack.c.bf16 %v1039_v32, %v1038_v31 }
  0x2b   : > { %216 = vrot.lane.b32.xlu0 %v1466_v19, %s1386_s28  ;;  %208 = vrot.lane.b32.xlu1 %v1466_v19, %s1387_s29  ;;  %244 = vst.msk [vmem:[#allocation2 + $0xb] sm:$0x1] %vm182_vm1, %v178_v24 }
  0x2f   : > { %224 = vrot.lane.b32.xlu1 %v1466_v19, %s1389_s30  ;;  %191 = vrot.lane.b32.xlu0 %v177_v22, %s1384_s26 }
  0x33   : > { %204 = vrot.lane.b32.xlu1 %v177_v22, %s1386_s28  ;;  %196 = vrot.lane.b32.xlu0 %v177_v22, %s1387_s29 }
  0x37   : > { %212 = vrot.lane.b32.xlu1 %v177_v22, %s1389_s30  ;;  %220 = vrot.lane.b32.xlu0 %v177_v22, %s1390_s3 }
  0x3b   : > { %228 = vrot.lane.b32.xlu1 %v177_v22, %s1391_s4  ;;  %236 = vrot.lane.b32.xlu0 %v177_v22, %s1385_s27  ;;  %v1051_v22 = vld [vmem:[%s1703_s0 + $0x98] sm:$0xff] }
  0x3c   : > { %v1230_v26 = vpack.c.bf16 %v1051_v22, %v1050_v21 }
  0x3f   : > { %240 = vrot.lane.b32.xlu1 %v1466_v19, %s1391_s4  ;;  %232 = vrot.lane.b32.xlu0 %v1466_v19, %s1390_s3 }
  0x43   : > { %256 = vrot.lane.b32.xlu1 %v178_v24, %s1387_s29  ;;  %251 = vrot.lane.b32.xlu0 %v178_v24, %s1384_s26 }
  0x47   : > { %272 = vrot.lane.b32.xlu1 %v178_v24, %s1389_s30  ;;  %264 = vrot.lane.b32.xlu0 %v178_v24, %s1386_s28 }
  0x4b   : > { %288 = vrot.lane.b32.xlu1 %v178_v24, %s1391_s4  ;;  %280 = vrot.lane.b32.xlu0 %v178_v24, %s1390_s3 }
  0x4f   : > { %246 = vrot.lane.b32.xlu1 %v1510_v37, %s1385_s27  ;;  %296 = vrot.lane.b32.xlu0 %v178_v24, %s1385_s27  ;;  %v1036_v24 = vld [vmem:[%s1703_s0 + $0x40] sm:$0xff]  ;;  %s1074_s27 = sshll.u32 %s1431_s13, 8  ;;  %s1320_s13 = scalar_lea.vmem %s1660_s23, 256 }
  0x50   : > { %v1210_v28 = vpack.c.bf16 %v1037_v25, %v1036_v24  ;;  %p1321_p11 = scmp.ne.s32.totalorder %s1660_s23, %s1320_s13 }
  0x52   : > { %p1322_p12 = pnand %p1321_p11, %p1448_p5 }
  0x53   : > { %268 = vrot.lane.b32.xlu1 %v1510_v37, %s1387_s29  ;;  %260 = vrot.lane.b32.xlu0 %v1510_v37, %s1384_s26  ;;  %s1662_s29 = scalar_lea.sflag [#allocation4], %s134_s17 }
  0x54   : > { %p1323_p13 = pneg %p1322_p12 }
  0x57   : > { %284 = vrot.lane.b32.xlu1 %v1510_v37, %s1389_s30  ;;  %276 = vrot.lane.b32.xlu0 %v1510_v37, %s1386_s28  ;;  %s1658_s28 = scalar_lea.hbm %s1705_s2, %s1074_s27  ;;  %s1392_s30 = smov [#allocation3]  }
  0x5b   : > { %300 = vrot.lane.b32.xlu1 %v1510_v37, %s1391_s4  ;;  %292 = vrot.lane.b32.xlu0 %v1510_v37, %s1390_s3  ;;  %s1324_s3 = sshll.u32 %s1392_s30, 4  ;;  %s1325_s3 = int_to_ptr.vmem [resolvable:$false] %s1324_s3 }
  0x5c   : > { %s1326_s4 = scalar_lea.vmem %s1325_s3, 512  ;;  %p1327_p0 = scmp.lt.s32.totalorder %s1660_s23, %s1325_s3 }
  0x5d   : > { %p1328_p1 = scmp.lt.s32.totalorder %s1326_s4, %s1320_s13 }
  0x5f   : > { %p1329_p2 = por %p1328_p1, %p1327_p0 }
  0x61   : > { %p1330_p3 = pnand %p1329_p2, %p1323_p13 }
  0x99   : > { %v201_v51 = vpop.permute.xlu0 %200  ;;  %v186_v52 = vpop.permute.xlu1 %185 }
  0x9a   : > { %189 = vst.msk [vmem:[#allocation2 + $0x3] sm:$0x1] %vm188_vm3, %v186_v52 }
  0x9d   : > { %v217_v53 = vpop.permute.xlu0 %216  ;;  %v209_v54 = vpop.permute.xlu1 %208 }
  0xa1   : > { %v225_v55 = vpop.permute.xlu1 %224  ;;  %v192_v56 = vpop.permute.xlu0 %191 }
  0xa2   : > { %194 = vst.msk [vmem:[#allocation2 + $0x4] sm:$0x1] %vm182_vm1, %v192_v56 }
  0xa3   : > { %195 = vst.msk [vmem:[#allocation2 + $0x4] sm:$0x1] %vm188_vm3, %v1466_v19  ;;  %v1206_v19 = vpack.c.bf16 %v309_v18, %v308_v17 }
  0xa5   : > { %v205_v57 = vpop.permute.xlu1 %204  ;;  %v197_v58 = vpop.permute.xlu0 %196 }
  0xa6   : > { %207 = vst.msk [vmem:[#allocation2 + $0x6] sm:$0x1] %vm182_vm1, %v205_v57  ;;  %199 = vst.msk [vmem:[#allocation2 + $0x5] sm:$0x1] %vm182_vm1, %v197_v58 }
  0xa7   : > { %211 = vst.msk [vmem:[#allocation2 + $0x6] sm:$0x1] %vm188_vm3, %v209_v54  ;;  %203 = vst.msk [vmem:[#allocation2 + $0x5] sm:$0x1] %vm188_vm3, %v201_v51 }
  0xa9   : > { %v213_v59 = vpop.permute.xlu1 %212  ;;  %v221_v60 = vpop.permute.xlu0 %220 }
  0xaa   : > { %215 = vst.msk [vmem:[#allocation2 + $0x7] sm:$0x1] %vm182_vm1, %v213_v59  ;;  %223 = vst.msk [vmem:[#allocation2 + $0x8] sm:$0x1] %vm182_vm1, %v221_v60 }
  0xab   : > { %219 = vst.msk [vmem:[#allocation2 + $0x7] sm:$0x1] %vm188_vm3, %v217_v53  ;;  %227 = vst.msk [vmem:[#allocation2 + $0x8] sm:$0x1] %vm188_vm3, %v225_v55 }
  0xad   : > { %v229_v61 = vpop.permute.xlu1 %228  ;;  %v237_v62 = vpop.permute.xlu0 %236 }
  0xae   : > { %231 = vst.msk [vmem:[#allocation2 + $0x9] sm:$0x1] %vm182_vm1, %v229_v61  ;;  %239 = vst.msk [vmem:[#allocation2 + $0xa] sm:$0x1] %vm182_vm1, %v237_v62 }
  0xb1   : > { %v241_v63 = vpop.permute.xlu1 %240  ;;  %v233_v0 = vpop.permute.xlu0 %232 }
  0xb2   : > { %243 = vst.msk [vmem:[#allocation2 + $0xa] sm:$0x1] %vm188_vm3, %v241_v63  ;;  %235 = vst.msk [vmem:[#allocation2 + $0x9] sm:$0x1] %vm188_vm3, %v233_v0  ;;  %v310_v1 = vld [vmem:[#allocation2 + $0x1] sm:$0xff] }
  0xb3   : > { %1125 = vmatprep.mubr.msk.f32.mxu1 %vm317_vm4, %v310_v1  ;;  %v304_v23 = vld [vmem:[#allocation2] sm:$0xff] }
  0xb5   : > { %v257_v2 = vpop.permute.xlu1 %256  ;;  %v252_v3 = vpop.permute.xlu0 %251 }
  0xb6   : > { %259 = vst.msk [vmem:[#allocation2 + $0xd] sm:$0x1] %vm182_vm1, %v257_v2  ;;  %254 = vst.msk [vmem:[#allocation2 + $0xc] sm:$0x1] %vm182_vm1, %v252_v3 }
  0xb7   : > { %255 = vst.msk [vmem:[#allocation2 + $0xc] sm:$0x1] %vm188_vm3, %v1510_v37  ;;  %v1056_v37 = vld [vmem:[%s1703_s0 + $0xb0] sm:$0xff] }
  0xb8   : > { %v1238_v40 = vpack.c.bf16 %v1057_v38, %v1056_v37 }
  0xb9   : > { %v273_v4 = vpop.permute.xlu1 %272  ;;  %v265_v5 = vpop.permute.xlu0 %264  ;;  %v570_v6 = vld [vmem:[#allocation2 + $0x3] sm:$0xff] }
  0xba   : > { %275 = vst.msk [vmem:[#allocation2 + $0xf] sm:$0x1] %vm182_vm1, %v273_v4  ;;  %267 = vst.msk [vmem:[#allocation2 + $0xe] sm:$0x1] %vm182_vm1, %v265_v5  ;;  %1158 = vmatprep.mubr.msk.f32.mxu0 %vm317_vm4, %v570_v6  ;;  %v480_v39 = vld [vmem:[#allocation2 + $0x2] sm:$0xff] }
  0xbd   : > { %v289_v7 = vpop.permute.xlu1 %288  ;;  %v281_v8 = vpop.permute.xlu0 %280 }
  0xbe   : > { %291 = vst.msk [vmem:[#allocation2 + $0x11] sm:$0x1] %vm182_vm1, %v289_v7  ;;  %283 = vst.msk [vmem:[#allocation2 + $0x10] sm:$0x1] %vm182_vm1, %v281_v8 }
  0xc1   : > { %v247_v9 = vpop.permute.xlu1 %246  ;;  %v297_v10 = vpop.permute.xlu0 %296 }
  0xc2   : > { %249 = vst.msk [vmem:[#allocation2 + $0xb] sm:$0x1] %vm188_vm3, %v247_v9 }
  0xc3   : > { %299 = vst.msk [vmem:[#allocation2 + $0x12] sm:$0x1] %vm182_vm1, %v297_v10 }
  0xc5   : > { %v269_v11 = vpop.permute.xlu1 %268  ;;  %v261_v12 = vpop.permute.xlu0 %260 }
  0xc6   : > { %271 = vst.msk [vmem:[#allocation2 + $0xe] sm:$0x1] %vm188_vm3, %v269_v11  ;;  %263 = vst.msk [vmem:[#allocation2 + $0xd] sm:$0x1] %vm188_vm3, %v261_v12 }
  0xc9   : > { %v285_v13 = vpop.permute.xlu1 %284  ;;  %v277_v14 = vpop.permute.xlu0 %276  ;;  %v660_v33 = vld [vmem:[#allocation2 + $0x4] sm:$0xff] }
  0xca   : > { %287 = vst.msk [vmem:[#allocation2 + $0x10] sm:$0x1] %vm188_vm3, %v285_v13  ;;  %279 = vst.msk [vmem:[#allocation2 + $0xf] sm:$0x1] %vm188_vm3, %v277_v14  ;;  %v750_v44 = vld [vmem:[#allocation2 + $0x5] sm:$0xff] }
  0xcd   : > { %v301_v15 = vpop.permute.xlu1 %300  ;;  %v293_v16 = vpop.permute.xlu0 %292  ;;  %v840_v51 = vld [vmem:[#allocation2 + $0x6] sm:$0xff] }
  0xce   : > { %303 = vst.msk [vmem:[#allocation2 + $0x12] sm:$0x1] %vm188_vm3, %v301_v15  ;;  %295 = vst.msk [vmem:[#allocation2 + $0x11] sm:$0x1] %vm188_vm3, %v293_v16 }
  0xd1   : > { %v311_v20 = vld [vmem:[#allocation2 + $0x9] sm:$0xff] }
  0xd2   : > { %1126 = vmatmul.mubr.msk.f32.vlgmr.msra.gmra.mrb[0].mxu1 %vm317_vm4, %v311_v20  ;;  %v305_v35 = vld [vmem:[#allocation2 + $0x8] sm:$0xff] }
  0xd3   : > { %1205 = vmatpush3.bf16.msra.mxu1 %v1533_v47  ;;  %1136 = vmatprep.mubr.msk.f32.mxu1 %vm317_vm4, %v304_v23  ;;  %v1062_v47 = vld [vmem:[%s1703_s0 + $0xd0] sm:$0xff] }
  0xd4   : > { %1207 = vmatprep.subr.bf16.mxu1 %v1206_v19  ;;  %v1246_v49 = vpack.c.bf16 %v1063_v48, %v1062_v47 }
  0xd5   : > { %v571_v27 = vld [vmem:[#allocation2 + $0xb] sm:$0xff] }
  0xd6   : > { %1159 = vmatmul.mubr.msk.f32.vlgmr.msra.gmra.mrb[0].mxu0 %vm317_vm4, %v571_v27  ;;  %v661_v41 = vld [vmem:[#allocation2 + $0xc] sm:$0xff] }
  0xd7   : > { %1229 = vmatpush3.bf16.msra.mxu0 %v1546_v50  ;;  %1209 = vmatpush3.bf16.msra.mxu1 %v1206_v19  ;;  %v481_v46 = vld [vmem:[#allocation2 + $0xa] sm:$0xff] }
  0xd8   : > { %1169 = vmatprep.mubr.msk.f32.mxu0 %vm317_vm4, %v660_v33  ;;  %1231 = vmatprep.subr.bf16.mxu0 %v1230_v26  ;;  %v751_v50 = vld [vmem:[#allocation2 + $0xd] sm:$0xff] }
  0xd9   : > { %1211 = vmatprep.subr.bf16.mxu1 %v1210_v28  ;;  %v841_v52 = vld [vmem:[#allocation2 + $0xe] sm:$0xff] }
  0xda   : > { %1137 = vmatmul.mubr.msk.f32.vlgmr.msra.gmra.mrb[0].mxu1 %vm317_vm4, %v305_v35 }
  0xdb   : > { %1233 = vmatpush3.bf16.msra.mxu0 %v1230_v26  ;;  %1213 = vmatpush3.bf16.msra.mxu1 %v1210_v28 }
  0xdc   : > { %1147 = vmatprep.mubr.msk.f32.mxu1 %vm317_vm4, %v480_v39  ;;  %1235 = vmatprep.subr.bf16.mxu0 %v1234_v34 }
  0xdd   : > { %1215 = vmatprep.subr.bf16.mxu1 %v1214_v36 }
  0xde   : > { %1170 = vmatmul.mubr.msk.f32.vlgmr.msra.gmra.mrb[0].mxu0 %vm317_vm4, %v661_v41 }
  0xdf   : > { %1237 = vmatpush3.bf16.msra.mxu0 %v1234_v34  ;;  %1217 = vmatpush3.bf16.msra.mxu1 %v1214_v36 }
  0xe0   : > { %1180 = vmatprep.mubr.msk.f32.mxu0 %vm317_vm4, %v750_v44  ;;  %1239 = vmatprep.subr.bf16.mxu0 %v1238_v40 }
  0xe2   : > { %1148 = vmatmul.mubr.msk.f32.vlgmr.msra.gmra.mrb[0].mxu1 %vm317_vm4, %v481_v46 }
  0xe3   : > { %1241 = vmatpush3.bf16.msra.mxu0 %v1238_v40 }
  0xe4   : > { %1243 = vmatprep.subr.bf16.mxu0 %v1242_v45 }
  0xe6   : > { %1181 = vmatmul.mubr.msk.f32.vlgmr.msra.gmra.mrb[0].mxu0 %vm317_vm4, %v751_v50 }
  0xe7   : > { %1245 = vmatpush3.bf16.msra.mxu0 %v1242_v45  ;;  %1191 = vmatprep.mubr.msk.f32.mxu0 %vm317_vm4, %v840_v51 }
  0xe8   : > { %1247 = vmatprep.subr.bf16.mxu0 %v1246_v49 }
  0xeb   : > { %1249 = vmatpush3.bf16.msra.mxu0 %v1246_v49 }
  0xee   : > { %1192 = vmatmul.mubr.msk.f32.vlgmr.msra.gmra.mrb[0].mxu0 %vm317_vm4, %v841_v52 }
 0x1b5   : > { %v1149_v53 = vpop.f32.mrb[0].mxu1 }
 0x1b6   : > { %v559_v54 = vpop.f32.mrb[1].mxu1 }
 0x1c1   : > { %v1193_v55 = vpop.f32.mrb[0].mxu0 }
 0x1c2   : > { %v1250_v56 = vadd.f32 %v1193_v55, %v1149_v53  ;;  %v919_v57 = vpop.f32.mrb[1].mxu0 }
 0x1c3   : > { %v1251_v58 = vadd.f32 %v919_v57, %v559_v54 }
 0x1c4   : > { %v1067_v59 = vmul.f32 -1.442695, %v1250_v56 }
 0x1c5   : > { %v1066_v60 = vmul.f32 -1.442695, %v1251_v58 }
 0x1c6   : > { %1312 = vpow2.f32 %v1067_v59 }
 0x1c7   : > { %1314 = vpow2.f32 %v1066_v60 }
 0x1d0   : > { %v1313_v61 = vpop.eup %1312 }
 0x1d1   : > { %v1315_v62 = vpop.eup %1314  ;;  %v937_v63 = vadd.f32 1.0, %v1313_v61 }
 0x1d2   : > { %v936_v0 = vadd.f32 1.0, %v1315_v62 }
 0x1d3   : > { %1316 = vrcp.f32 %v937_v63 }
 0x1d4   : > { %1318 = vrcp.f32 %v936_v0 }
 0x1dd   : > { %v1317_v1 = vpop.eup %1316 }
 0x1de   : > { %v1319_v2 = vpop.eup %1318  ;;  %944 = vst.msk [vmem:[%s136_s22 + $0x8] sm:$0xff] %vm942_vm5, %v1317_v1 }
 0x1df   : > { %943 = vst.msk [vmem:[%s136_s22] sm:$0xff] %vm942_vm5, %v1319_v2 }
 0x1e0   : > { %1333 = shalt.err (!%p1330_p3)
}
 0x1e1   : > { %s1334_s25 = scalar_lea.hbm %s1658_s28, 256  ;;  %s1338_s7 = scalar_lea.hbm %s1705_s2, 512 }
 0x1e2   : > { %p1335_p4 = scmp.ne.s32.totalorder %s1658_s28, %s1334_s25  ;;  %p1339_p9 = scmp.lt.u32.totalorder %s1658_s28, %s1705_s2 }
 0x1e3   : > { %p1340_p10 = scmp.lt.u32.totalorder %s1338_s7, %s1334_s25  ;;  %p1342_p12 = scmp.lt.u32.totalorder %s1334_s25, %s1658_s28 }
 0x1e4   : > { %p1336_p7 = pnand %p1335_p4, %p1448_p5 }
 0x1e5   : > { %p1341_p11 = por %p1340_p10, %p1339_p9 }
 0x1e6   : > { %p1337_p8 = pneg %p1336_p7 }
 0x1e7   : > { %p1343_p13 = por %p1342_p12, %p1341_p11 }
 0x1e9   : > { %p1344_p0 = pnand %p1343_p13, %p1337_p8 }
 0x1eb   : > { %1347 = shalt.err (!%p1344_p0)
}
 0x1ec   : > { %s1393_s16 = smov 128   ;;  %s1394_s17 = smov 8  }
 0x1ed   : > { %1262 = dma.vmem_to_hbm [thread:$0]  (%p1448_p5), %s1660_s23, 256, %s1658_s28, %s1662_s29, %s1393_s16, %s1393_s16, %s1394_s17  }
 0x1ee PF: > { %p1268_p1 = scmp.ge.s32.totalorder %s1382_s12, 2  ;;  %s974_s21 = sand.u32 1, %s1370_s9  }
 0x1ef   : > { %s975_s27 = scalar_lea.sflag [#allocation4], %s974_s21 }
 0x1f0   : > { %p1265_p2 = pnand %p1268_p1, %p1452_p6 }
 0x1f2   : > { %1365 = dma.done.wait (!%p1265_p2), %s975_s27, 256  }
 0x1f3   : > { %1367 = vsyncadd (!%p1265_p2), %s975_s27, 4294967040  ;;  %p12_p3 = scmp.ge.s32.totalorder %s1435_s15, 4   ;;  %s1708_s9 = smov %s1374_s10 }
 0x1f4   : > { %s1709_s10 = smov %s1378_s11  ;;  %s1710_s11 = smov %s1446_s18 }
 0x1f5   : > { %s1711_s12 = smov %s1435_s15  ;;  %14 = sbr.rel (!%p12_p3) target bundleno = 3 (0x3), region = 69 }
 0x1fc   :  { %980 = vsyncpa [#allocation4], 1 }
 0x1fd   :  { %982 = vsyncpa [#allocation4 + $0x1], 1 }

</bundles_post_ra>
